<compile_context>
chip_gen: v5e
topology: v5e:2x2
jax: 0.10.0
libtpu: 0.0.40
codegen_flags: <defaults>
</compile_context>

<pallas_src>
import functools

import jax
import jax.numpy as jnp
from jax import lax
from jax.experimental import pallas as pl
from jax.experimental.pallas import tpu as pltpu

# ----- physical / clamp constants (match the PyTorch globals) -----
R_KCAL = 0.0019872036
INTER_MIN = -30.0
INTER_MAX = 30.0
LB = 1e-05
UB = 60.0
# TODO(synk): ll_du / ul_du are defined outside the provided PyTorch snippet;
# deterministic symmetric bounds are used here (overridable via the wrapper).
LL_DU = -1.0e6
UL_DU = 1.0e6

_HP = jax.lax.Precision.HIGHEST  # keep f32 fidelity with the PyTorch math


def _round_up(x, m):
    return -(-x // m) * m


# --------------------------------------------------------------------------
# One-time weight packing (hoisted out of the per-call hot path).
# --------------------------------------------------------------------------
def prepare_crnn_weights(w_in, w_b, w_out):
    """Pack/pad weights once.  Padding contract (keeps the math exact):

      * w_full_t[:, k_in:] == 0  -> filler feature rows (value 1.0) add 0.
      * w_full_t[nr:, :]   == 0  -> padded reactions give inter == 0,
        exp(0) == 1, which then multiplies zero columns of w_out_pad -> 0.
      * w_out_pad[ns:, :]  == 0  -> padded output rows are exactly 0.
    """
    w_in = jnp.asarray(w_in, jnp.float32)
    w_b = jnp.asarray(w_b, jnp.float32).reshape(-1)
    w_out = jnp.asarray(w_out, jnp.float32)

    ns, nr = w_out.shape
    assert w_in.shape == (ns + 2, nr), (w_in.shape, ns, nr)
    assert w_b.shape == (nr,)

    k_in = ns + 3                      # species | -1/(R*T) | log T | bias(1)
    k_pad = _round_up(k_in, 8)
    nr_up = _round_up(nr, 8)
    ns_up = _round_up(ns, 8)

    # (nr, k_in): reaction-major weights, feature columns.
    w_full = jnp.concatenate(
        [w_in[:ns, :].T,               # species columns
         w_in[ns:ns + 1, :].T,         # -1/(R*T) column
         w_in[ns + 1:ns + 2, :].T,     # log T column
         w_b[:, None]],                # bias column (hits the constant-1 row)
        axis=1)
    w_full_t = jnp.pad(w_full, ((0, nr_up - nr), (0, k_pad - k_in)))
    w_out_pad = jnp.pad(w_out, ((0, ns_up - ns), (0, nr_up - nr)))

    return dict(w_full_t=w_full_t, w_out_pad=w_out_pad,
                ns=ns, nr=nr, k_pad=k_pad, nr_up=nr_up, ns_up=ns_up)


# --------------------------------------------------------------------------
# Kernel (feature-major: batch on the lane axis).
# --------------------------------------------------------------------------
def crnn_kernel(x_ref, wft_ref, wout_ref, du_ref, *, ns, ll_du, ul_du):
    # x_ref:    (k_pad, B_blk)  rows: u^T | T | T | 1 | 1-filler
    # wft_ref:  (nr_up, k_pad)  resident packed weights (see prepare)
    # wout_ref: (ns_up, nr_up)  resident padded w_out
    # du_ref:   (ns_up, B_blk)  du^T, lane-dense along batch
    x = x_ref[...]
    row = lax.broadcasted_iota(jnp.int32, x.shape, 0)

    log_u = jnp.log(jnp.clip(x, LB, UB))     # valid for species rows
    inv_rt = -1.0 / (R_KCAL * x)             # valid for temperature row (ns)
    log_t = jnp.log(x)                       # valid for temperature row (ns+1)

    wv = jnp.where(row < ns, log_u,
                   jnp.where(row == ns, inv_rt,
                             jnp.where(row == ns + 1, log_t, x)))

    # inter^T = w_in.T @ w_v + w_b  (bias folded via the constant-1 row)
    inter = jnp.dot(wft_ref[...], wv,
                    precision=_HP, preferred_element_type=jnp.float32)
    inter = jnp.clip(inter, INTER_MIN, INTER_MAX)
    rates = jnp.exp(inter)                                   # (nr_up, B_blk)

    du = jnp.dot(wout_ref[...], rates,
                 precision=_HP, preferred_element_type=jnp.float32)
    du_ref[...] = jnp.clip(du, ll_du, ul_du).astype(du_ref.dtype)


# --------------------------------------------------------------------------
# Batch tiling policy.
# --------------------------------------------------------------------------
def _pick_batch_tiling(B, b_blk=None):
    if b_blk is not None:
        b_blk = _round_up(b_blk, 128)
        return _round_up(B, b_blk), b_blk
    b_pad = _round_up(B, 128)
    if b_pad <= 1024:
        # Small batch: one lane-dense block, minimal padding, grid = 1.
        return b_pad, b_pad
    # Large batch: 512-wide blocks (multiple of 256 for the v6e/v7x MXU);
    # gives >= 2 grid steps so the "parallel" axis can shard on v7x megacore.
    return _round_up(B, 512), 512


# --------------------------------------------------------------------------
# Wrapper (hot path).
# --------------------------------------------------------------------------
def crnn_forward(u, T, params, *, b_blk=None, ll_du=LL_DU, ul_du=UL_DU,
                 out_dtype=jnp.float32):
    """Batched CRNNFunc.forward; row i of u with T[i] is one forward(t_i, u_i).

    `params` is the dict returned by prepare_crnn_weights (call it once).
    """
    u = jnp.asarray(u, jnp.float32)
    T = jnp.asarray(T, jnp.float32).reshape(-1)
    B, ns = u.shape
    assert ns == params["ns"], (ns, params["ns"])
    assert T.shape == (B,)

    k_pad = params["k_pad"]
    nr_up = params["nr_up"]
    ns_up = params["ns_up"]

    b_pad, b_blk = _pick_batch_tiling(B, b_blk)

    # Feature-major input block (batch on lanes):
    #   rows 0..ns-1 : u^T
    #   row  ns      : T   -> -1/(R*T) in-kernel
    #   row  ns+1    : T   -> log T    in-kernel
    #   row  ns+2    : 1.0 (bias); remaining rows 1.0 hit zero weight columns
    # Padded batch lanes are filled with 1.0 (benign, sliced off afterwards).
    x = jnp.concatenate(
        [u.T, T[None, :], T[None, :],
         jnp.ones((k_pad - (ns + 2), B), jnp.float32)], axis=0)
    x = jnp.pad(x, ((0, 0), (0, b_pad - B)), constant_values=1.0)

    grid = (b_pad // b_blk,)
    out = pl.pallas_call(
        functools.partial(crnn_kernel, ns=ns, ll_du=ll_du, ul_du=ul_du),
        out_shape=jax.ShapeDtypeStruct((ns_up, b_pad), out_dtype),
        grid=grid,
        in_specs=[
            pl.BlockSpec((k_pad, b_blk), lambda i: (0, i)),
            pl.BlockSpec((nr_up, k_pad), lambda i: (0, 0)),   # resident weight
            pl.BlockSpec((ns_up, nr_up), lambda i: (0, 0)),   # resident weight
        ],
        out_specs=pl.BlockSpec((ns_up, b_blk), lambda i: (0, i)),
        compiler_params=pltpu.CompilerParams(
            dimension_semantics=("parallel",)),
    )(x, params["w_full_t"], params["w_out_pad"])

    return out[:ns, :B].T


# --------------------------------------------------------------------------
# Pure-JAX reference (mirrors the PyTorch math exactly, batched).
# --------------------------------------------------------------------------
def crnn_forward_ref(u, T, w_in, w_b, w_out, *, ll_du=LL_DU, ul_du=UL_DU):
    u = jnp.asarray(u, jnp.float32)
    T = jnp.asarray(T, jnp.float32).reshape(-1)
    w_in = jnp.asarray(w_in, jnp.float32)
    w_b = jnp.asarray(w_b, jnp.float32).reshape(-1)
    w_out = jnp.asarray(w_out, jnp.float32)

    y = jnp.clip(u, LB, UB)
    w_v = jnp.concatenate(
        [jnp.log(y), (-1.0 / (R_KCAL * T))[:, None], jnp.log(T)[:, None]],
        axis=1)                                                    # (B, ns+2)
    inter = jnp.dot(w_v, w_in, precision=_HP) + w_b[None, :]       # (B, nr)
    inter = jnp.clip(inter, INTER_MIN, INTER_MAX)
    du = jnp.dot(jnp.exp(inter), w_out.T, precision=_HP)           # (B, ns)
    return jnp.clip(du, ll_du, ul_du)


if __name__ == "__main__":
    key = jax.random.PRNGKey(0)
    k1, k2, k3, k4, k5, k6 = jax.random.split(key, 6)

    ns = 8       # number of species
    nr = 32      # number of reactions
    B = 300      # batch of (t, u) evaluation points

    # Deterministic synthetic weights (shapes implied by the forward pass).
    w_in = 0.1 * jax.random.normal(k1, (ns + 2, nr), dtype=jnp.float32)
    w_b = 0.1 * jax.random.normal(k2, (nr,), dtype=jnp.float32)
    w_out = 0.1 * jax.random.normal(k3, (ns, nr), dtype=jnp.float32)

    # Synthetic experiment profile: tsteps / Tlist / Plist, interpolated in
    # glue (the itpT / itpP role in the PyTorch code).
    n_pts = 16
    tsteps = jnp.linspace(0.0, 1.0, n_pts, dtype=jnp.float32)
    Tlist = 900.0 + 200.0 * jax.random.uniform(k4, (n_pts,), dtype=jnp.float32)
    Plist = 1.0 + jax.random.uniform(k5, (n_pts,), dtype=jnp.float32)

    t_query = jnp.linspace(0.05, 0.95, B, dtype=jnp.float32)
    T = jnp.interp(t_query, tsteps, Tlist)   # itpT(t)
    P = jnp.interp(t_query, tsteps, Plist)   # itpP(t) (unused by forward)

    # Positive species state.
    u = 1e-3 + jax.random.uniform(k6, (B, ns), dtype=jnp.float32)

    # One-time weight packing (hoisted out of the hot path).
    params = prepare_crnn_weights(w_in, w_b, w_out)

    # Small batch: single lane-dense block (b_pad=384, grid=1).
    du = jax.block_until_ready(crnn_forward(u, T, params))
    du_ref = crnn_forward_ref(u, T, w_in, w_b, w_out)
    assert du.shape == (B, ns)
    assert bool(jnp.all(jnp.isfinite(du)))
    assert bool(jnp.allclose(du, du_ref, rtol=1e-4, atol=1e-4)), float(
        jnp.max(jnp.abs(du - du_ref)))

    # Larger batch: exercises the multi-block (grid > 1) tiling path.
    u2 = jnp.tile(u, (4, 1))          # (1200, ns)
    T2 = jnp.tile(T, 4)               # (1200,)
    du2 = jax.block_until_ready(crnn_forward(u2, T2, params))
    du2_ref = crnn_forward_ref(u2, T2, w_in, w_b, w_out)
    assert du2.shape == (4 * B, ns)
    assert bool(jnp.all(jnp.isfinite(du2)))
    assert bool(jnp.allclose(du2, du2_ref, rtol=1e-4, atol=1e-4)), float(
        jnp.max(jnp.abs(du2 - du2_ref)))

    print("KERNEL_OK")
</pallas_src>

<mosaic_0001>
module attributes {stable_mosaic.version = 11 : i64} {
  func.func @crnn_kernel(%arg0: i32, %arg1: memref<16x384xf32, #tpu.memory_space<vmem>>, %arg2: memref<32x16xf32, #tpu.memory_space<vmem>>, %arg3: memref<8x32xf32, #tpu.memory_space<vmem>>, %arg4: memref<8x384xf32, #tpu.memory_space<vmem>>) attributes {dimension_semantics = [#tpu.dimension_semantics<parallel>], iteration_bounds = array<i64: 1>, scalar_prefetch = 0 : i64, scratch_operands = 0 : i64, tpu.core_type = #tpu.core_type<tc>, window_params = [{transform_indices = @transform_0, window_bounds = array<i64: 16, 384>}, {pipeline_mode = #tpu.pipeline_mode<synchronous>, transform_indices = @transform_1, window_bounds = array<i64: 32, 16>}, {pipeline_mode = #tpu.pipeline_mode<synchronous>, transform_indices = @transform_2, window_bounds = array<i64: 8, 32>}, {transform_indices = @transform_3, window_bounds = array<i64: 8, 384>}]} {
    %c0 = arith.constant 0 : index
    %c0_0 = arith.constant 0 : index
    %0 = vector.load %arg1[%c0, %c0_0] : memref<16x384xf32, #tpu.memory_space<vmem>>, vector<16x384xf32>
    %1 = tpu.iota {dimensions = array<i32: 0>} : vector<16x384xi32>
    %cst = arith.constant 9.99999974E-6 : f32
    %cst_1 = arith.constant 6.000000e+01 : f32
    %2 = vector.broadcast %cst : f32 to vector<16x384xf32>
    %3 = arith.maximumf %2, %0 : vector<16x384xf32>
    %4 = vector.broadcast %cst_1 : f32 to vector<16x384xf32>
    %5 = arith.minimumf %4, %3 : vector<16x384xf32>
    %6 = math.log %5 : vector<16x384xf32>
    %cst_2 = arith.constant 0.00198720349 : f32
    %7 = vector.broadcast %cst_2 : f32 to vector<16x384xf32>
    %8 = arith.mulf %7, %0 : vector<16x384xf32>
    %cst_3 = arith.constant -1.000000e+00 : f32
    %9 = vector.broadcast %cst_3 : f32 to vector<16x384xf32>
    %10 = arith.divf %9, %8 : vector<16x384xf32>
    %11 = math.log %0 : vector<16x384xf32>
    %c8_i32 = arith.constant 8 : i32
    %12 = vector.broadcast %c8_i32 : i32 to vector<16x384xi32>
    %13 = arith.cmpi slt, %1, %12 : vector<16x384xi32>
    %c8_i32_4 = arith.constant 8 : i32
    %14 = vector.broadcast %c8_i32_4 : i32 to vector<16x384xi32>
    %15 = arith.cmpi eq, %1, %14 : vector<16x384xi32>
    %c9_i32 = arith.constant 9 : i32
    %16 = vector.broadcast %c9_i32 : i32 to vector<16x384xi32>
    %17 = arith.cmpi eq, %1, %16 : vector<16x384xi32>
    %18 = arith.select %17, %11, %0 : vector<16x384xi1>, vector<16x384xf32>
    %19 = arith.select %15, %10, %18 : vector<16x384xi1>, vector<16x384xf32>
    %20 = arith.select %13, %6, %19 : vector<16x384xi1>, vector<16x384xf32>
    %c0_5 = arith.constant 0 : index
    %c0_6 = arith.constant 0 : index
    %21 = vector.load %arg2[%c0_5, %c0_6] : memref<32x16xf32, #tpu.memory_space<vmem>>, vector<32x16xf32>
    %cst_7 = arith.constant dense<0.000000e+00> : vector<32x384xf32>
    %22 = tpu.matmul %21, %20, %cst_7 {dimension_numbers = #tpu.dot_dimension_numbers<[1], [0], [0], [1], [0, 0, 1, 1], [], []>, precision = #tpu.contract_precision<fp32>} : vector<32x16xf32>, vector<16x384xf32>, vector<32x384xf32> -> vector<32x384xf32>
    %cst_8 = arith.constant -3.000000e+01 : f32
    %cst_9 = arith.constant 3.000000e+01 : f32
    %23 = vector.broadcast %cst_8 : f32 to vector<32x384xf32>
    %24 = arith.maximumf %23, %22 : vector<32x384xf32>
    %25 = vector.broadcast %cst_9 : f32 to vector<32x384xf32>
    %26 = arith.minimumf %25, %24 : vector<32x384xf32>
    %27 = math.exp %26 : vector<32x384xf32>
    %c0_10 = arith.constant 0 : index
    %c0_11 = arith.constant 0 : index
    %28 = vector.load %arg3[%c0_10, %c0_11] : memref<8x32xf32, #tpu.memory_space<vmem>>, vector<8x32xf32>
    %cst_12 = arith.constant dense<0.000000e+00> : vector<8x384xf32>
    %29 = tpu.matmul %28, %27, %cst_12 {dimension_numbers = #tpu.dot_dimension_numbers<[1], [0], [0], [1], [0, 0, 1, 1], [], []>, precision = #tpu.contract_precision<fp32>} : vector<8x32xf32>, vector<32x384xf32>, vector<8x384xf32> -> vector<8x384xf32>
    %cst_13 = arith.constant -1.000000e+06 : f32
    %cst_14 = arith.constant 1.000000e+06 : f32
    %30 = vector.broadcast %cst_13 : f32 to vector<8x384xf32>
    %31 = arith.maximumf %30, %29 : vector<8x384xf32>
    %32 = vector.broadcast %cst_14 : f32 to vector<8x384xf32>
    %33 = arith.minimumf %32, %31 : vector<8x384xf32>
    %c0_15 = arith.constant 0 : index
    %c0_16 = arith.constant 0 : index
    %34 = vector.load %arg4[%c0_15, %c0_16] : memref<8x384xf32, #tpu.memory_space<vmem>>, vector<8x384xf32>
    tpu.vector_store %arg4[%c0_15, %c0_16], %33 {strides = array<i32>} : memref<8x384xf32, #tpu.memory_space<vmem>>, vector<8x384xf32>,
    return
  }
  func.func @transform_0(%arg0: i32) -> (i32, i32) {
    %c0_i32 = arith.constant 0 : i32
    %c0_i32_0 = arith.constant 0 : i32
    return %c0_i32, %arg0 : i32, i32
  }
  func.func @transform_1(%arg0: i32) -> (i32, i32) {
    %c0_i32 = arith.constant 0 : i32
    %c0_i32_0 = arith.constant 0 : i32
    %c0_i32_1 = arith.constant 0 : i32
    return %c0_i32, %c0_i32_0 : i32, i32
  }
  func.func @transform_2(%arg0: i32) -> (i32, i32) {
    %c0_i32 = arith.constant 0 : i32
    %c0_i32_0 = arith.constant 0 : i32
    %c0_i32_1 = arith.constant 0 : i32
    return %c0_i32, %c0_i32_0 : i32, i32
  }
  func.func @transform_3(%arg0: i32) -> (i32, i32) {
    %c0_i32 = arith.constant 0 : i32
    %c0_i32_0 = arith.constant 0 : i32
    return %c0_i32, %arg0 : i32, i32
  }
}

</mosaic_0001>

<bundles_post_ra>
// kernel: tpu_custom_call.1
= control target key start
LH: loop header
LB: loop body
LE: loop exit
PB: predicated region body
PF: predicated region fallthrough
CT: control target
= control target key end

     0   :  { %8 = vsyncpa [#allocation3], 0  ;;  %s2028_s0 = inlined_call_operand.vmem [shape: f32[16,384], index: 0, kind: input, shape index: {}]   ;;  %s2029_s1 = inlined_call_operand.vmem [shape: f32[32,16], index: 1, kind: input, shape index: {}]   ;;  %s2030_s2 = inlined_call_operand.hbm [shape: f32[8,32], index: 2, kind: input, shape index: {}]   ;;  %s2031_s3 = inlined_call_operand.hbm [shape: f32[8,384], index: 3, kind: output, shape index: {}]  }
   0x1   :  { %9 = vsyncpa [#allocation4], 0  ;;  %s19_s14 = sshll.u32 %s2030_s2, 4  ;;  %s1712_s15 = smov [#allocation2]   ;;  %s20_s14 = int_to_ptr.hbm [resolvable:$true] %s19_s14 }
   0x2   :  { %s21_s16 = sshll.u32 %s1712_s15, 4  ;;  %s22_s16 = int_to_ptr.vmem [resolvable:$true] %s21_s16 }
   0x3   :  { %24 = dma.hbm_to_vmem [thread:$0]  %s20_s14, 128, %s22_s16, [#allocation3]  }
   0x4   :  { %1708 = dma.done.wait [#allocation3], 128  }
   0x5   :  { %1709 = vsyncadd [#allocation3], 4294967168  ;;  %v35_v0 = vlaneseq  ;;  %v32_v1 = vld [vmem:[%s2028_s0 + $0x18] sm:$0xff]  ;;  %v29_v2 = vld [vmem:[%s2028_s0] sm:$0xff]  ;;  %vm198_vm0 = vcmask 130048   ;;  %vm1016_vm15 = vcmask 261120  }
   0x6   :  { %v194_v3 = vld [vmem:[%s2029_s1] sm:$0xff]  ;;  %v65_v4 = vmul.f32 0.0019872035, %v32_v1  ;;  %v38_v5 = vmax.f32 %v29_v2, 1e-05  ;;  %v195_v13 = vld [vmem:[%s2029_s1 + $0x8] sm:$0xff] }
   0x7   :  { %v1749_v6 = vld [vmem:[%s2028_s0 + $0x20] sm:$0xff]  ;;  %v36_v7 = vshrl.u32 %v35_v0, 7  ;;  %v200_v8 = vsel %vm198_vm0, %v194_v3, 0  ;;  %v30_v17 = vld [vmem:[%s2028_s0 + $0x8] sm:$0xff]  ;;  %v203_v20 = vsel %vm198_vm0, %v195_v13, 0  ;;  %v196_v45 = vld [vmem:[%s2029_s1 + $0x10] sm:$0xff] }
   0x8   :  { %1618 = vrcp.f32 %v65_v4  ;;  %v44_v9 = vmin.f32 %v38_v5, 60.0  ;;  %v66_v10 = vmul.f32 0.0019872035, %v1749_v6  ;;  %v1753_v11 = vand.u32 4294901760, %v200_v8  ;;  %s1591_s11 = sshll.u32 %s2031_s3, 4  ;;  %s1592_s11 = int_to_ptr.hbm [resolvable:$true] %s1591_s11 }
   0x9   :  { %1620 = vlog2.f32 %v32_v1  ;;  %v1755_v12 = vadd.s32 8, %v36_v7  ;;  %v122_v15 = vand.u32 2147483647, %v65_v4  ;;  %v124_v16 = vand.u32 2147483648, %v65_v4 }
   0xa   :  { %1622 = vlog2.f32 %v44_v9  ;;  %v1764_v19 = vsub.f32 %v200_v8, %v1753_v11  ;;  %vm118_vm2 = vweird.f32 %v65_v4  ;;  %v39_v24 = vmax.f32 %v30_v17, 1e-05 }
   0xb   :  { %1624 = vrcp.f32 %v66_v10  ;;  %vm175_vm1 = vcmp.eq.s32.totalorder %v1755_v12, 9  ;;  %vm1769_vm4 = vcmp.eq.f32.partialorder %v122_v15, 8.507059e+37  ;;  %v125_v27 = vor.u32 1.1754944e-38, %v124_v16 }
   0xc   :  { %1626 = vlog2.f32 %v1749_v6  ;;  %v1773_v29 = vand.u32 4294901760, %v203_v20  ;;  %v1776_v32 = vand.u32 4294901760, %v1764_v19  ;;  %vm133_vm6 = vweird.f32 %v66_v10 }
   0xd   :  { %v139_v36 = vand.u32 2147483648, %v66_v10  ;;  %v137_v39 = vand.u32 2147483647, %v66_v10  ;;  %v45_v40 = vmin.f32 %v39_v24, 60.0  ;;  %vm173_vm8 = vcmp.eq.s32.totalorder %v1755_v12, 8 }
   0xe   :  { %v1619_v14 = vpop.eup %1618  ;;  %v1786_v42 = vsub.f32 %v203_v20, %v1773_v29  ;;  %v232_v52 = vsub.f32 %v1764_v19, %v1776_v32  ;;  %v206_v54 = vsel %vm198_vm0, %v196_v45, 0 }
   0xf   :  { %v114_v18 = vmul.f32 %v1619_v14, %v65_v4  ;;  %v1621_v21 = vpop.eup %1620  ;;  %vm119_vm3 = vweird.f32 %v1619_v14  ;;  %1628 = vlog2.f32 %v45_v40  ;;  %v140_v49 = vor.u32 1.1754944e-38, %v139_v36  ;;  %v197_v4 = vld [vmem:[%s2029_s1 + $0x18] sm:$0xff] }
  0x10   :  { %v1623_v22 = vpop.eup %1622  ;;  %v165_v31 = vmul.f32 0.6931472, %v1621_v21  ;;  %vm1778_vm5 = vmor %vm118_vm2, %vm119_vm3  ;;  %vm138_vm10 = vcmp.eq.f32.partialorder %v137_v39, 8.507059e+37  ;;  %v1808_v62 = vand.u32 4294901760, %v232_v52  ;;  %v1811_v63 = vand.u32 4294901760, %v1786_v42 }
  0x11   :  { %v115_v23 = vsub.f32 1.0, %v114_v18  ;;  %v1625_v25 = vpop.eup %1624  ;;  %v51_v28 = vmul.f32 0.6931472, %v1623_v22  ;;  %v1813_v0 = vand.u32 4294901760, %v206_v54  ;;  %v209_v15 = vsel %vm198_vm0, %v197_v4, 0 }
  0x12   :  { %v129_v33 = vmul.f32 %v1625_v25, %v66_v10  ;;  %vm134_vm7 = vweird.f32 %v1625_v25  ;;  %v1627_v41 = vpop.eup %1626  ;;  %v179_v44 = vsel %vm175_vm1, %v165_v31, %v32_v1  ;;  %v240_v10 = vsub.f32 %v1786_v42, %v1811_v63 }
  0x13   :  { %v116_v30 = vmul.f32 %v1619_v14, %v115_v23  ;;  %v1782_v35 = vand.u32 4294901760, %v51_v28  ;;  %vm135_vm9 = vmor %vm133_vm6, %vm134_vm7  ;;  %v167_v50 = vmul.f32 0.6931472, %v1627_v41  ;;  %v1826_v13 = vsub.f32 %v206_v54, %v1813_v0 }
  0x14   :  { %v130_v38 = vsub.f32 1.0, %v129_v33  ;;  %v1831_v23 = vand.u32 4294901760, %v240_v10 }
  0x15   :  { %v117_v37 = vadd.f32 %v1619_v14, %v116_v30  ;;  %v283_v48 = vsub.f32 %v51_v28, %v1782_v35  ;;  %v180_v60 = vsel %vm175_vm1, %v167_v50, %v1749_v6  ;;  %v1629_v61 = vpop.eup %1628  ;;  %v1834_v24 = vand.u32 4294901760, %v1826_v13 }
  0x16   :  { %v131_v46 = vmul.f32 %v1625_v25, %v130_v38  ;;  %v53_v3 = vmul.f32 0.6931472, %v1629_v61  ;;  %v34_v38 = vld [vmem:[%s2028_s0 + $0x28] sm:$0xff] }
  0x17   :  { %v121_v43 = vsel %vm1778_vm5, %v1619_v14, %v117_v37  ;;  %v284_v58 = vand.u32 4294901760, %v283_v48  ;;  %v248_v30 = vsub.f32 %v1826_v13, %v1834_v24  ;;  %v67_v39 = vmul.f32 0.0019872035, %v34_v38 }
  0x18   :  { %v126_v47 = vsel %vm1769_vm4, %v125_v27, %v121_v43  ;;  %v132_v53 = vadd.f32 %v1625_v25, %v131_v46  ;;  %v479_v9 = vand.u32 4294901760, %v53_v3 }
  0x19   :  { %v127_v51 = vmul.f32 -1.0, %v126_v47  ;;  %v285_v7 = vsub.f32 %v283_v48, %v284_v58  ;;  %v1848_v34 = vand.u32 4294901760, %v248_v30  ;;  %1630 = vrcp.f32 %v67_v39  ;;  %v31_v47 = vld [vmem:[%s2028_s0 + $0x10] sm:$0xff]  ;;  %s1713_s0 = smov [#allocation5]  }
  0x1a   :  { %v136_v56 = vsel %vm135_vm9, %v1625_v25, %v132_v53  ;;  %v535_v17 = vsub.f32 %v53_v3, %v479_v9  ;;  %v1836_v25 = vand.u32 4294901760, %v209_v15  ;;  %1632 = vlog2.f32 %v34_v38  ;;  %s1589_s8 = sshll.u32 %s1713_s0, 4  ;;  %s1590_s8 = int_to_ptr.vmem [resolvable:$true] %s1589_s8 }
  0x1b   :  { %v185_v55 = vsel %vm173_vm8, %v127_v51, %v179_v44  ;;  %v141_v59 = vsel %vm138_vm10, %v140_v49, %v136_v56  ;;  %v286_v20 = vand.u32 4294901760, %v285_v7  ;;  %v154_v43 = vand.u32 2147483648, %v67_v39 }
  0x1c   :  { %v225_v57 = vand.u32 4294901760, %v185_v55  ;;  %v142_v1 = vmul.f32 -1.0, %v141_v59  ;;  %v536_v22 = vand.u32 4294901760, %v535_v17  ;;  %v1843_v31 = vsub.f32 %v209_v15, %v1836_v25 }
  0x1d   :  { %vm148_vm11 = vweird.f32 %v67_v39  ;;  %v152_v46 = vand.u32 2147483647, %v67_v39  ;;  %v40_v49 = vmax.f32 %v31_v47, 1e-05  ;;  %v155_v50 = vor.u32 1.1754944e-38, %v154_v43 }
  0x1e   :  { %226 = vmatpush.msra.mxu0 %v225_v57  ;;  %v277_v2 = vsub.f32 %v185_v55, %v225_v57  ;;  %361 = vmatpush.msra.mxu3 %v225_v57  ;;  %v186_v5 = vsel %vm173_vm8, %v142_v1, %v180_v60  ;;  %v537_v27 = vsub.f32 %v535_v17, %v536_v22  ;;  %v1851_v36 = vand.u32 4294901760, %v1843_v31 }
  0x1f   :  { %v477_v8 = vand.u32 4294901760, %v186_v5  ;;  %v1631_v40 = vpop.eup %1630  ;;  %vm153_vm14 = vcmp.eq.f32.partialorder %v152_v46, 8.507059e+37  ;;  %v46_v53 = vmin.f32 %v40_v49, 60.0 }
  0x20   :  { %228 = vmatpush.msra.mxu0 %v1782_v35  ;;  %321 = vmatpush.msra.mxu2 %v277_v2  ;;  %v278_v6 = vand.u32 4294901760, %v277_v2  ;;  %v538_v33 = vand.u32 4294901760, %v537_v27  ;;  %v256_v37 = vsub.f32 %v1843_v31, %v1851_v36  ;;  %v144_v41 = vmul.f32 %v1631_v40, %v67_v39  ;;  %v1633_v44 = vpop.eup %1632 }
  0x21   :  { %234 = vmatmul.f32.vlgmr.msra.gmra.mxu0 %v1808_v62  ;;  %363 = vmatpush.msra.mxu3 %v1782_v35  ;;  %v529_v16 = vsub.f32 %v186_v5, %v477_v8  ;;  %vm149_vm12 = vweird.f32 %v1631_v40  ;;  %v169_v51 = vmul.f32 0.6931472, %v1633_v44  ;;  %1634 = vlog2.f32 %v46_v53 }
  0x22   :  { %324 = vmatpush.msra.mxu2 %v283_v48  ;;  %v279_v14 = vsub.f32 %v277_v2, %v278_v6  ;;  %367 = vmatmul.f32.vlgmr.msra.gmra.mxu3 %v1776_v32  ;;  %v145_v45 = vsub.f32 1.0, %v144_v41  ;;  %vm150_vm13 = vmor %vm148_vm11, %vm149_vm12 }
  0x23   :  { %327 = vmatmul.f32.vlgmr.msra.gmra.mxu2 %v1764_v19  ;;  %406 = vmatpush.msrb.mxu0 %v278_v6  ;;  %v530_v21 = vand.u32 4294901760, %v529_v16  ;;  %v181_v56 = vsel %vm175_vm1, %v169_v51, %v34_v38 }
  0x24   :  { %v280_v18 = vand.u32 4294901760, %v279_v14  ;;  %478 = vmatpush.msrb.mxu2 %v477_v8  ;;  %v146_v48 = vmul.f32 %v1631_v40, %v145_v45 }
  0x25   :  { %410 = vmatpush.msrb.mxu0 %v284_v58  ;;  %v531_v26 = vsub.f32 %v529_v16, %v530_v21 }
  0x26   :  { %281 = vmatpush.msra.mxu1 %v280_v18  ;;  %480 = vmatpush.msrb.mxu2 %v479_v9  ;;  %v147_v52 = vadd.f32 %v1631_v40, %v146_v48 }
  0x27   :  { %573 = vmatpush.msra.mxu0 %v529_v16  ;;  %v532_v28 = vand.u32 4294901760, %v531_v26  ;;  %v1635_v60 = vpop.eup %1634 }
  0x28   :  { %658 = vmatpush.msra.mxu2 %v530_v21  ;;  %287 = vmatpush.msra.mxu1 %v286_v20  ;;  %v151_v54 = vsel %vm150_vm13, %v1631_v40, %v147_v52  ;;  %v55_v1 = vmul.f32 0.6931472, %v1635_v60 }
  0x29   :  { %242 = vmatmul.f32.gmra.mxu0 %v1831_v23  ;;  %289 = vmatmul.f32.vlgmr.msra.gmra.mxu1 %v1753_v11  ;;  %v156_v55 = vsel %vm153_vm14, %v155_v50, %v151_v54 }
  0x2a   :  { %443 = vmatpush.msrb.mxu1 %v225_v57  ;;  %373 = vmatmul.f32.gmra.mxu3 %v1811_v63  ;;  %v157_v57 = vmul.f32 -1.0, %v156_v55  ;;  %v731_v3 = vand.u32 4294901760, %v55_v1 }
  0x2b   :  { %332 = vmatmul.f32.gmra.mxu2 %v1786_v42  ;;  %533 = vmatpush.msrb.mxu3 %v532_v28 }
  0x2c   :  { %445 = vmatpush.msrb.mxu1 %v1782_v35  ;;  %576 = vmatpush.msra.mxu0 %v535_v17  ;;  %v1859_v35 = vand.u32 4294901760, %v256_v37  ;;  %v187_v58 = vsel %vm173_vm8, %v157_v57, %v181_v56  ;;  %v787_v5 = vsub.f32 %v55_v1, %v731_v3 }
  0x2d   :  { %539 = vmatpush.msrb.mxu3 %v538_v33  ;;  %662 = vmatpush.msra.mxu2 %v536_v22  ;;  %v729_v59 = vand.u32 4294901760, %v187_v58 }
  0x2e   :  { %613 = vmatpush.msra.mxu1 %v477_v8  ;;  %v788_v6 = vand.u32 4294901760, %v787_v5 }
  0x2f   :  { %695 = vmatpush.msra.mxu3 %v477_v8  ;;  %v781_v61 = vsub.f32 %v187_v58, %v729_v59 }
  0x30   :  { %615 = vmatpush.msra.mxu1 %v479_v9  ;;  %v789_v7 = vsub.f32 %v787_v5, %v788_v6 }
  0x31   :  { %697 = vmatpush.msra.mxu3 %v479_v9  ;;  %250 = vmatmul.f32.gmra.mxu0 %v1848_v34  ;;  %v782_v2 = vand.u32 4294901760, %v781_v61 }
  0x32   :  { %293 = vmatmul.f32.gmra.mxu1 %v1773_v29  ;;  %379 = vmatmul.f32.gmra.mxu3 %v1834_v24  ;;  %v790_v8 = vand.u32 4294901760, %v789_v7 }
  0x33   :  { %337 = vmatmul.f32.gmra.mxu2 %v1826_v13  ;;  %v783_v4 = vsub.f32 %v781_v61, %v782_v2 }
  0x35   :  { %v784_v12 = vand.u32 4294901760, %v783_v4 }
  0x39   :  { %258 = vmatmul.f32.gmra.mxu0 %v1859_v35 }
  0x3a   :  { %297 = vmatmul.f32.gmra.mxu1 %v1813_v0  ;;  %385 = vmatmul.f32.gmra.mxu3 %v1851_v36 }
  0x3b   :  { %342 = vmatmul.f32.gmra.mxu2 %v1843_v31 }
  0x41   :  { %412 = vmatmul.f32.vlgmr.msrb.gmra.mxu0 %v1753_v11 }
  0x42   :  { %301 = vmatmul.f32.gmra.mxu1 %v1836_v25  ;;  %541 = vmatmul.f32.vlgmr.msrb.gmra.mxu3 %v1753_v11 }
  0x43   :  { %486 = vmatmul.f32.vlgmr.msrb.gmra.mxu2 %v1808_v62  ;;  %730 = vmatpush.msrb.mxu0 %v729_v59 }
  0x44   :  { %865 = vmatpush.msrb.mxu3 %v729_v59  ;;  %825 = vmatpush.msrb.mxu2 %v781_v61 }
  0x45   :  { %732 = vmatpush.msrb.mxu0 %v731_v3 }
  0x46   :  { %867 = vmatpush.msrb.mxu3 %v731_v3  ;;  %828 = vmatpush.msrb.mxu2 %v787_v5 }
  0x49   :  { %416 = vmatmul.f32.gmra.mxu0 %v1773_v29 }
  0x4a   :  { %447 = vmatmul.f32.vlgmr.msrb.gmra.mxu1 %v1753_v11  ;;  %545 = vmatmul.f32.gmra.mxu3 %v1773_v29 }
  0x4b   :  { %494 = vmatmul.f32.gmra.mxu2 %v1831_v23  ;;  %785 = vmatpush.msrb.mxu1 %v784_v12 }
  0x4d   :  { %791 = vmatpush.msrb.mxu1 %v790_v8 }
  0x51   :  { %420 = vmatmul.f32.gmra.mxu0 %v1813_v0 }
  0x52   :  { %451 = vmatmul.f32.gmra.mxu1 %v1773_v29  ;;  %549 = vmatmul.f32.gmra.mxu3 %v1813_v0 }
  0x53   :  { %502 = vmatmul.f32.gmra.mxu2 %v1848_v34 }
  0x59   :  { %424 = vmatmul.f32.gmra.mxu0 %v1836_v25 }
  0x5a   :  { %455 = vmatmul.f32.gmra.mxu1 %v1813_v0  ;;  %553 = vmatmul.f32.gmra.mxu3 %v1836_v25 }
  0x5b   :  { %510 = vmatmul.f32.gmra.mxu2 %v1859_v35 }
  0x61   :  { %579 = vmatmul.f32.vlgmr.msra.gmra.mxu0 %v1764_v19 }
  0x62   :  { %459 = vmatmul.f32.gmra.mxu1 %v1836_v25  ;;  %699 = vmatmul.f32.vlgmr.msra.gmra.mxu3 %v1753_v11 }
  0x63   :  { %664 = vmatmul.f32.vlgmr.msra.gmra.mxu2 %v1753_v11  ;;  %910 = vmatpush.msra.mxu0 %v782_v2 }
  0x65   :  { %914 = vmatpush.msra.mxu0 %v788_v6 }
  0x69   :  { %584 = vmatmul.f32.gmra.mxu0 %v1786_v42 }
  0x6a   :  { %619 = vmatmul.f32.vlgmr.msra.gmra.mxu1 %v1776_v32  ;;  %703 = vmatmul.f32.gmra.mxu3 %v1773_v29 }
  0x6b   :  { %947 = vmatpush.msra.mxu1 %v729_v59  ;;  %668 = vmatmul.f32.gmra.mxu2 %v1773_v29  ;;  %v1015_v59 = vld [vmem:[#allocation2] sm:$0xff] }
  0x6c   :  { %v1018_v12 = vsel %vm1016_vm15, %v1015_v59, 0 }
  0x6d   :  { %949 = vmatpush.msra.mxu1 %v731_v3  ;;  %v1940_v7 = vand.u32 4294901760, %v1018_v12 }
  0x71   :  { %589 = vmatmul.f32.gmra.mxu0 %v1826_v13 }
  0x72   :  { %625 = vmatmul.f32.gmra.mxu1 %v1811_v63  ;;  %707 = vmatmul.f32.gmra.mxu3 %v1813_v0 }
  0x73   :  { %672 = vmatmul.f32.gmra.mxu2 %v1813_v0 }
  0x79   :  { %594 = vmatmul.f32.gmra.mxu0 %v1843_v31 }
  0x7a   :  { %631 = vmatmul.f32.gmra.mxu1 %v1834_v24  ;;  %711 = vmatmul.f32.gmra.mxu3 %v1836_v25 }
  0x7b   :  { %676 = vmatmul.f32.gmra.mxu2 %v1836_v25 }
  0x81   :  { %738 = vmatmul.f32.vlgmr.msrb.gmra.mxu0 %v1808_v62 }
  0x82   :  { %637 = vmatmul.f32.gmra.mxu1 %v1851_v36  ;;  %871 = vmatmul.f32.vlgmr.msrb.gmra.mxu3 %v1776_v32 }
  0x83   :  { %831 = vmatmul.f32.vlgmr.msrb.gmra.mxu2 %v1764_v19 }
  0x89   :  { %746 = vmatmul.f32.gmra.mxu0 %v1831_v23 }
  0x8a   :  { %793 = vmatmul.f32.vlgmr.msrb.gmra.mxu1 %v1753_v11  ;;  %877 = vmatmul.f32.gmra.mxu3 %v1811_v63 }
  0x8b   :  { %836 = vmatmul.f32.gmra.mxu2 %v1786_v42 }
  0x91   :  { %754 = vmatmul.f32.gmra.mxu0 %v1848_v34 }
  0x92   :  { %797 = vmatmul.f32.gmra.mxu1 %v1773_v29  ;;  %883 = vmatmul.f32.gmra.mxu3 %v1834_v24 }
  0x93   :  { %841 = vmatmul.f32.gmra.mxu2 %v1826_v13 }
  0x99   :  { %762 = vmatmul.f32.gmra.mxu0 %v1859_v35 }
  0x9a   :  { %801 = vmatmul.f32.gmra.mxu1 %v1813_v0  ;;  %889 = vmatmul.f32.gmra.mxu3 %v1851_v36 }
  0x9b   :  { %846 = vmatmul.f32.gmra.mxu2 %v1843_v31 }
  0x9e   :  { %v235_v19 = vpop.f32.mrf.mxu0 }
  0xa1   :  { %916 = vmatmul.f32.vlgmr.msra.gmra.mxu0 %v1753_v11 }
  0xa2   :  { %805 = vmatmul.f32.gmra.mxu1 %v1836_v25 }
  0xa5   :  { %v368_v32 = vpop.f32.mrf.mxu3 }
  0xa6   :  { %v243_v42 = vpop.f32.mrf.mxu0  ;;  %v290_v62 = vpop.f32.mrf.mxu1 }
  0xa7   :  { %v328_v63 = vpop.f32.mrf.mxu2  ;;  %v291_v28 = vadd.f32 %v290_v62, %v235_v19 }
  0xa9   :  { %920 = vmatmul.f32.gmra.mxu0 %v1773_v29  ;;  %v329_v33 = vadd.f32 %v328_v63, %v291_v28 }
  0xaa   :  { %951 = vmatmul.f32.vlgmr.msra.gmra.mxu1 %v1753_v11 }
  0xab   :  { %v369_v39 = vadd.f32 %v368_v32, %v329_v33 }
  0xad   :  { %v374_v9 = vpop.f32.mrf.mxu3 }
  0xae   :  { %v251_v10 = vpop.f32.mrf.mxu0 }
  0xaf   :  { %v294_v13 = vpop.f32.mrf.mxu1  ;;  %v333_v14 = vpop.f32.mrf.mxu2 }
  0xb0   :  { %v295_v27 = vadd.f32 %v294_v13, %v243_v42 }
  0xb1   :  { %924 = vmatmul.f32.gmra.mxu0 %v1813_v0 }
  0xb2   :  { %955 = vmatmul.f32.gmra.mxu1 %v1773_v29  ;;  %v334_v30 = vadd.f32 %v333_v14, %v295_v27 }
  0xb4   :  { %v375_v37 = vadd.f32 %v374_v9, %v334_v30 }
  0xb5   :  { %v380_v15 = vpop.f32.mrf.mxu3 }
  0xb6   :  { %v259_v16 = vpop.f32.mrf.mxu0 }
  0xb7   :  { %v298_v17 = vpop.f32.mrf.mxu1  ;;  %v338_v18 = vpop.f32.mrf.mxu2 }
  0xb8   :  { %v299_v31 = vadd.f32 %v298_v17, %v251_v10  ;;  %v1945_v10 = vsub.f32 %v1018_v12, %v1940_v7 }
  0xb9   :  { %928 = vmatmul.f32.gmra.mxu0 %v1836_v25 }
  0xba   :  { %959 = vmatmul.f32.gmra.mxu1 %v1813_v0  ;;  %v339_v35 = vadd.f32 %v338_v18, %v299_v31 }
  0xbd   :  { %v386_v20 = vpop.f32.mrf.mxu3 }
  0xbe   :  { %v413_v22 = vpop.f32.mrf.mxu0 }
  0xbf   :  { %v302_v21 = vpop.f32.mrf.mxu1  ;;  %v343_v11 = vpop.f32.mrf.mxu2  ;;  %v414_v43 = vadd.f32 %v413_v22, %v369_v39 }
  0xc0   :  { %v303_v41 = vadd.f32 %v302_v21, %v259_v16 }
  0xc2   :  { %963 = vmatmul.f32.gmra.mxu1 %v1836_v25  ;;  %v381_v25 = vadd.f32 %v380_v15, %v339_v35  ;;  %v344_v50 = vadd.f32 %v343_v11, %v303_v41 }
  0xc4   :  { %v387_v56 = vadd.f32 %v386_v20, %v344_v50  ;;  %v1955_v20 = vand.u32 4294901760, %v1945_v10 }
  0xc5   :  { %v1932_v23 = vpop.f32.mrf.mxu3 }
  0xc6   :  { %v417_v24 = vpop.f32.mrf.mxu0 }
  0xc7   :  { %v448_v26 = vpop.f32.mrf.mxu1  ;;  %v1934_v29 = vpop.f32.mrf.mxu2  ;;  %v418_v40 = vadd.f32 %v417_v24, %v375_v37 }
  0xc8   :  { %v449_v45 = vadd.f32 %v448_v26, %v414_v43  ;;  %v543_v22 = vadd.f32 %v1932_v23, %v1934_v29  ;;  %v1043_v23 = vsub.f32 %v1945_v10, %v1955_v20 }
  0xca   :  { %v1601_v54 = vclamps-f32 %v449_v45, 30.0  ;;  %v1976_v41 = vand.u32 4294901760, %v1043_v23 }
  0xcc   :  { %v991_v60 = vmul.f32 1.442695, %v1601_v54 }
  0xcd   :  { %v546_v34 = vpop.f32.mrf.mxu3 }
  0xce   :  { %v421_v36 = vpop.f32.mrf.mxu0 }
  0xcf   :  { %v452_v0 = vpop.f32.mrf.mxu1  ;;  %v495_v38 = vpop.f32.mrf.mxu2  ;;  %v422_v46 = vadd.f32 %v421_v36, %v381_v25 }
  0xd0   :  { %v453_v44 = vadd.f32 %v452_v0, %v418_v40  ;;  %v547_v16 = vadd.f32 %v546_v34, %v495_v38 }
  0xd2   :  { %v1604_v51 = vclamps-f32 %v453_v44, 30.0 }
  0xd4   :  { %v997_v57 = vmul.f32 1.442695, %v1604_v51 }
  0xd5   :  { %v550_v47 = vpop.f32.mrf.mxu3 }
  0xd6   :  { %v425_v48 = vpop.f32.mrf.mxu0 }
  0xd7   :  { %v456_v49 = vpop.f32.mrf.mxu1  ;;  %v503_v53 = vpop.f32.mrf.mxu2  ;;  %v426_v61 = vadd.f32 %v425_v48, %v387_v56 }
  0xd8   :  { %v457_v52 = vadd.f32 %v456_v49, %v422_v46  ;;  %v551_v38 = vadd.f32 %v550_v47, %v503_v53 }
  0xda   :  { %v1607_v55 = vclamps-f32 %v457_v52, 30.0 }
  0xdc   :  { %v1003_v58 = vmul.f32 1.442695, %v1607_v55 }
  0xdd   :  { %v1936_v1 = vpop.f32.mrf.mxu3 }
  0xde   :  { %1636 = vpow2.f32 %v1003_v58  ;;  %v580_v3 = vpop.f32.mrf.mxu0 }
  0xdf   :  { %v460_v2 = vpop.f32.mrf.mxu1  ;;  %1638 = vpow2.f32 %v997_v57  ;;  %v1938_v5 = vpop.f32.mrf.mxu2  ;;  %v581_v29 = vadd.f32 %v580_v3, %v543_v22 }
  0xe0   :  { %v461_v4 = vadd.f32 %v460_v2, %v426_v61  ;;  %1640 = vpow2.f32 %v991_v60  ;;  %v555_v58 = vadd.f32 %v1936_v1, %v1938_v5 }
  0xe2   :  { %v1610_v6 = vclamps-f32 %v461_v4, 30.0 }
  0xe4   :  { %v1637_v8 = vpop.eup %1636  ;;  %v1009_v19 = vmul.f32 1.442695, %v1610_v6 }
  0xe5   :  { %v1639_v32 = vpop.eup %1638  ;;  %v700_v42 = vpop.f32.mrf.mxu3  ;;  %v1942_v9 = vand.u32 4294901760, %v1637_v8 }
  0xe6   :  { %1642 = vpow2.f32 %v1009_v19  ;;  %v585_v62 = vpop.f32.mrf.mxu0  ;;  %v1641_v13 = vpop.eup %1640  ;;  %v1947_v15 = vand.u32 4294901760, %v1639_v32 }
  0xe7   :  { %v620_v63 = vpop.f32.mrf.mxu1  ;;  %v665_v14 = vpop.f32.mrf.mxu2  ;;  %v1949_v17 = vand.u32 4294901760, %v1641_v13  ;;  %v1952_v18 = vsub.f32 %v1637_v8, %v1942_v9  ;;  %v586_v26 = vadd.f32 %v585_v62, %v547_v16 }
  0xe8   :  { %v1962_v24 = vsub.f32 %v1639_v32, %v1947_v15  ;;  %v621_v39 = vadd.f32 %v620_v63, %v581_v29 }
  0xe9   :  { %v1069_v33 = vand.u32 4294901760, %v1952_v18  ;;  %v1968_v34 = vsub.f32 %v1641_v13, %v1949_v17 }
  0xea   :  { %v1075_v35 = vand.u32 4294901760, %v1962_v24  ;;  %v666_v48 = vadd.f32 %v665_v14, %v621_v39 }
  0xeb   :  { %v1070_v25 = vsub.f32 %v1952_v18, %v1069_v33  ;;  %v1081_v43 = vand.u32 4294901760, %v1968_v34 }
  0xec   :  { %v1643_v21 = vpop.eup %1642  ;;  %v1076_v46 = vsub.f32 %v1962_v24, %v1075_v35  ;;  %v701_v59 = vadd.f32 %v700_v42, %v666_v48 }
  0xed   :  { %v1959_v11 = vand.u32 4294901760, %v1643_v21  ;;  %v704_v27 = vpop.f32.mrf.mxu3  ;;  %v1071_v52 = vand.u32 4294901760, %v1070_v25  ;;  %v1082_v53 = vsub.f32 %v1968_v34, %v1081_v43 }
  0xee   :  { %v590_v28 = vpop.f32.mrf.mxu0  ;;  %v1077_v57 = vand.u32 4294901760, %v1076_v46  ;;  %v1602_v4 = vclamps-f32 %v701_v59, 30.0 }
  0xef   :  { %v626_v30 = vpop.f32.mrf.mxu1  ;;  %1033 = vmatpush.msra.mxu2 %v1959_v11  ;;  %v1062_v31 = vsub.f32 %v1643_v21, %v1959_v11  ;;  %v669_v0 = vpop.f32.mrf.mxu2  ;;  %v591_v49 = vadd.f32 %v590_v28, %v551_v38  ;;  %v1083_v61 = vand.u32 4294901760, %v1082_v53 }
  0xf0   :  { %v627_v36 = vadd.f32 %v626_v30, %v586_v26  ;;  %v993_v63 = vmul.f32 1.442695, %v1602_v4 }
  0xf1   :  { %1035 = vmatpush.msra.mxu2 %v1942_v9  ;;  %v1063_v37 = vand.u32 4294901760, %v1062_v31 }
  0xf2   :  { %v670_v44 = vadd.f32 %v669_v0, %v627_v36 }
  0xf3   :  { %1037 = vmatpush.msra.mxu2 %v1947_v15  ;;  %v1064_v40 = vsub.f32 %v1062_v31, %v1063_v37 }
  0xf4   :  { %v705_v54 = vadd.f32 %v704_v27, %v670_v44 }
  0xf5   :  { %1039 = vmatpush.msra.mxu2 %v1949_v17  ;;  %v1065_v45 = vand.u32 4294901760, %v1064_v40  ;;  %v708_v47 = vpop.f32.mrf.mxu3 }
  0xf6   :  { %v595_v50 = vpop.f32.mrf.mxu0  ;;  %1045 = vmatmul.f32.vlgmr.msra.gmra.mxu2 %v1976_v41  ;;  %v1605_v2 = vclamps-f32 %v705_v54, 30.0 }
  0xf7   :  { %1104 = vmatpush.msrb.mxu2 %v1062_v31  ;;  %v632_v51 = vpop.f32.mrf.mxu1  ;;  %1066 = vmatpush.msra.mxu3 %v1065_v45  ;;  %v673_v56 = vpop.f32.mrf.mxu2  ;;  %v596_v12 = vadd.f32 %v595_v50, %v555_v58 }
  0xf8   :  { %v633_v55 = vadd.f32 %v632_v51, %v591_v49  ;;  %v999_v1 = vmul.f32 1.442695, %v1605_v2 }
  0xf9   :  { %1107 = vmatpush.msrb.mxu2 %v1952_v18  ;;  %1072 = vmatpush.msra.mxu3 %v1071_v52 }
  0xfa   :  { %v674_v60 = vadd.f32 %v673_v56, %v633_v55 }
  0xfb   :  { %1110 = vmatpush.msrb.mxu2 %v1962_v24  ;;  %1078 = vmatpush.msra.mxu3 %v1077_v57 }
  0xfc   :  { %v709_v3 = vadd.f32 %v708_v47, %v674_v60 }
  0xfd   :  { %1113 = vmatpush.msrb.mxu2 %v1968_v34  ;;  %1084 = vmatpush.msra.mxu3 %v1083_v61  ;;  %v712_v62 = vpop.f32.mrf.mxu3 }
  0xfe   :  { %v1608_v6 = vclamps-f32 %v709_v3, 30.0  ;;  %v1989_v19 = vpop.f32.mrf.mxu0  ;;  %1086 = vmatmul.f32.vlgmr.msra.gmra.mxu3 %v1940_v7  ;;  %1116 = vmatmul.f32.vlgmr.msrb.gmra.mxu2 %v1945_v10 }
  0xff   :  { %1162 = vmatpush.msra.mxu2 %v1063_v37  ;;  %1133 = vmatpush.msrb.mxu3 %v1959_v11  ;;  %v638_v8 = vpop.f32.mrf.mxu1  ;;  %v677_v42 = vpop.f32.mrf.mxu2 }
 0x100   :  { %v1005_v5 = vmul.f32 1.442695, %v1608_v6  ;;  %v639_v32 = vadd.f32 %v638_v8, %v596_v12 }
 0x101   :  { %1166 = vmatpush.msra.mxu2 %v1069_v33  ;;  %1135 = vmatpush.msrb.mxu3 %v1942_v9 }
 0x102   :  { %1644 = vpow2.f32 %v1005_v5  ;;  %v678_v13 = vadd.f32 %v677_v42, %v639_v32 }
 0x103   :  { %1170 = vmatpush.msra.mxu2 %v1075_v35  ;;  %1137 = vmatpush.msrb.mxu3 %v1947_v15  ;;  %1646 = vpow2.f32 %v999_v1 }
 0x104   :  { %v713_v14 = vadd.f32 %v712_v62, %v678_v13  ;;  %1648 = vpow2.f32 %v993_v63 }
 0x105   :  { %1174 = vmatpush.msra.mxu2 %v1081_v43  ;;  %1139 = vmatpush.msrb.mxu3 %v1949_v17  ;;  %v872_v46 = vpop.f32.mrf.mxu3 }
 0x106   :  { %v1611_v16 = vclamps-f32 %v713_v14, 30.0  ;;  %v1997_v18 = vpop.f32.mrf.mxu0  ;;  %1143 = vmatmul.f32.vlgmr.msrb.gmra.mxu3 %v1955_v20  ;;  %1176 = vmatmul.f32.vlgmr.msra.gmra.mxu2 %v1940_v7 }
 0x107   :  { %1193 = vmatpush.msra.mxu3 %v1959_v11  ;;  %v1999_v21 = vpop.f32.mrf.mxu1  ;;  %v832_v35 = vpop.f32.mrf.mxu2 }
 0x108   :  { %v1645_v22 = vpop.eup %1644  ;;  %v1011_v24 = vmul.f32 1.442695, %v1611_v16  ;;  %v795_v58 = vadd.f32 %v1999_v21, %v1989_v19 }
 0x109   :  { %1195 = vmatpush.msra.mxu3 %v1942_v9  ;;  %v1647_v26 = vpop.eup %1646  ;;  %v1219_v11 = vand.u32 4294901760, %v1645_v22 }
 0x10a   :  { %1650 = vpow2.f32 %v1011_v24  ;;  %v1649_v27 = vpop.eup %1648  ;;  %v1221_v28 = vand.u32 4294901760, %v1647_v26  ;;  %v833_v2 = vadd.f32 %v832_v35, %v795_v58 }
 0x10b   :  { %1197 = vmatpush.msra.mxu3 %v1947_v15  ;;  %v1253_v33 = vsub.f32 %v1645_v22, %v1219_v11  ;;  %v1223_v9 = vand.u32 4294901760, %v1649_v27 }
 0x10c   :  { %v1259_v29 = vsub.f32 %v1647_v26, %v1221_v28  ;;  %v873_v1 = vadd.f32 %v872_v46, %v833_v2 }
 0x10d   :  { %1199 = vmatpush.msra.mxu3 %v1949_v17  ;;  %v1265_v36 = vsub.f32 %v1649_v27, %v1223_v9  ;;  %v1254_v0 = vand.u32 4294901760, %v1253_v33  ;;  %v878_v54 = vpop.f32.mrf.mxu3 }
 0x10e   :  { %v2006_v30 = vpop.f32.mrf.mxu0  ;;  %1201 = vmatmul.f32.vlgmr.msra.gmra.mxu3 %v1940_v7  ;;  %v1260_v37 = vand.u32 4294901760, %v1259_v29 }
 0x10f   :  { %v798_v31 = vpop.f32.mrf.mxu1  ;;  %v1255_v25 = vsub.f32 %v1253_v33, %v1254_v0  ;;  %v1266_v43 = vand.u32 4294901760, %v1265_v36  ;;  %v837_v53 = vpop.f32.mrf.mxu2 }
 0x110   :  { %v1651_v34 = vpop.eup %1650  ;;  %v1261_v45 = vsub.f32 %v1259_v29, %v1260_v37  ;;  %v799_v57 = vadd.f32 %v798_v31, %v1997_v18 }
 0x111   :  { %v1217_v23 = vand.u32 4294901760, %v1651_v34  ;;  %v1256_v48 = vand.u32 4294901760, %v1255_v25  ;;  %v1267_v49 = vsub.f32 %v1265_v36, %v1266_v43 }
 0x112   :  { %v1262_v47 = vand.u32 4294901760, %v1261_v45  ;;  %v838_v60 = vadd.f32 %v837_v53, %v799_v57 }
 0x113   :  { %1218 = vmatpush.msrb.mxu2 %v1217_v23  ;;  %1318 = vmatpush.msrb.mxu1 %v1217_v23  ;;  %v1247_v15 = vsub.f32 %v1651_v34, %v1217_v23  ;;  %v1268_v52 = vand.u32 4294901760, %v1267_v49 }
 0x114   :  { %v879_v12 = vadd.f32 %v878_v54, %v838_v60 }
 0x115   :  { %1220 = vmatpush.msrb.mxu2 %v1219_v11  ;;  %1289 = vmatpush.msrb.mxu0 %v1247_v15  ;;  %v1248_v17 = vand.u32 4294901760, %v1247_v15  ;;  %v884_v3 = vpop.f32.mrf.mxu3 }
 0x116   :  { %1320 = vmatpush.msrb.mxu1 %v1219_v11  ;;  %v763_v38 = vpop.f32.mrf.mxu0 }
 0x117   :  { %v802_v39 = vpop.f32.mrf.mxu1  ;;  %1222 = vmatpush.msrb.mxu2 %v1221_v28  ;;  %1292 = vmatpush.msrb.mxu0 %v1253_v33  ;;  %v1249_v40 = vsub.f32 %v1247_v15, %v1248_v17  ;;  %v842_v59 = vpop.f32.mrf.mxu2 }
 0x118   :  { %1322 = vmatpush.msrb.mxu1 %v1221_v28  ;;  %v803_v61 = vadd.f32 %v802_v39, %v2006_v30 }
 0x119   :  { %1224 = vmatpush.msrb.mxu2 %v1223_v9  ;;  %1295 = vmatpush.msrb.mxu0 %v1259_v29  ;;  %v1250_v44 = vand.u32 4294901760, %v1249_v40 }
 0x11a   :  { %1324 = vmatpush.msrb.mxu1 %v1223_v9  ;;  %1230 = vmatmul.f32.vlgmr.msrb.gmra.mxu2 %v1976_v41  ;;  %v843_v6 = vadd.f32 %v842_v59, %v803_v61 }
 0x11b   :  { %1347 = vmatpush.msra.mxu2 %v1248_v17  ;;  %1251 = vmatpush.msrb.mxu3 %v1250_v44 }
 0x11c   :  { %1298 = vmatpush.msrb.mxu0 %v1265_v36  ;;  %1328 = vmatmul.f32.vlgmr.msrb.gmra.mxu1 %v1955_v20  ;;  %v885_v32 = vadd.f32 %v884_v3, %v843_v6 }
 0x11d   :  { %1351 = vmatpush.msra.mxu2 %v1254_v0  ;;  %1301 = vmatmul.f32.vlgmr.msrb.gmra.mxu0 %v1945_v10  ;;  %v890_v24 = vpop.f32.mrf.mxu3 }
 0x11e   :  { %1257 = vmatpush.msrb.mxu3 %v1256_v48  ;;  %v917_v51 = vpop.f32.mrf.mxu0 }
 0x11f   :  { %1355 = vmatpush.msra.mxu2 %v1260_v37  ;;  %v806_v50 = vpop.f32.mrf.mxu1  ;;  %v918_v62 = vadd.f32 %v917_v51, %v873_v1  ;;  %v847_v13 = vpop.f32.mrf.mxu2 }
 0x120   :  { %1263 = vmatpush.msrb.mxu3 %v1262_v47  ;;  %v807_v42 = vadd.f32 %v806_v50, %v763_v38 }
 0x121   :  { %1359 = vmatpush.msra.mxu2 %v1266_v43 }
 0x122   :  { %1269 = vmatpush.msrb.mxu3 %v1268_v52  ;;  %1361 = vmatmul.f32.vlgmr.msra.gmra.mxu2 %v1940_v7  ;;  %v848_v18 = vadd.f32 %v847_v13, %v807_v42 }
 0x123   :  { %1271 = vmatmul.f32.vlgmr.msrb.gmra.mxu3 %v1940_v7 }
 0x124   :  { %1378 = vmatpush.msra.mxu3 %v1217_v23 }
 0x126   :  { %1380 = vmatpush.msra.mxu3 %v1219_v11  ;;  %v921_v55 = vpop.f32.mrf.mxu0 }
 0x127   :  { %v952_v56 = vpop.f32.mrf.mxu1  ;;  %v922_v5 = vadd.f32 %v921_v55, %v879_v12 }
 0x128   :  { %1382 = vmatpush.msra.mxu3 %v1221_v28  ;;  %v953_v19 = vadd.f32 %v952_v56, %v918_v62  ;;  %v891_v28 = vadd.f32 %v890_v24, %v848_v18 }
 0x12a   :  { %1384 = vmatpush.msra.mxu3 %v1223_v9  ;;  %v1603_v26 = vclamps-f32 %v953_v19, 30.0 }
 0x12b   :  { %1386 = vmatmul.f32.vlgmr.msra.gmra.mxu3 %v1940_v7 }
 0x12c   :  { %v995_v33 = vmul.f32 1.442695, %v1603_v26 }
 0x12e   :  { %v925_v8 = vpop.f32.mrf.mxu0 }
 0x12f   :  { %v956_v4 = vpop.f32.mrf.mxu1  ;;  %v926_v14 = vadd.f32 %v925_v8, %v885_v32 }
 0x130   :  { %v957_v63 = vadd.f32 %v956_v4, %v922_v5 }
 0x132   :  { %v1606_v21 = vclamps-f32 %v957_v63, 30.0 }
 0x134   :  { %v1001_v30 = vmul.f32 1.442695, %v1606_v21 }
 0x136   :  { %v929_v27 = vpop.f32.mrf.mxu0 }
 0x137   :  { %v960_v16 = vpop.f32.mrf.mxu1  ;;  %v930_v9 = vadd.f32 %v929_v27, %v891_v28 }
 0x138   :  { %v961_v22 = vadd.f32 %v960_v16, %v926_v14 }
 0x13a   :  { %v1609_v11 = vclamps-f32 %v961_v22, 30.0 }
 0x13c   :  { %v1007_v31 = vmul.f32 1.442695, %v1609_v11 }
 0x13e   :  { %1652 = vpow2.f32 %v1007_v31 }
 0x13f   :  { %v964_v34 = vpop.f32.mrf.mxu1  ;;  %1654 = vpow2.f32 %v1001_v30 }
 0x140   :  { %v965_v23 = vadd.f32 %v964_v34, %v930_v9  ;;  %1656 = vpow2.f32 %v995_v33 }
 0x142   :  { %v1612_v29 = vclamps-f32 %v965_v23, 30.0 }
 0x144   :  { %v1653_v15 = vpop.eup %1652  ;;  %v1013_v36 = vmul.f32 1.442695, %v1612_v29 }
 0x145   :  { %v1655_v0 = vpop.eup %1654  ;;  %v1404_v17 = vand.u32 4294901760, %v1653_v15 }
 0x146   :  { %1658 = vpow2.f32 %v1013_v36  ;;  %v1657_v37 = vpop.eup %1656  ;;  %v1406_v35 = vand.u32 4294901760, %v1655_v0 }
 0x147   :  { %v1438_v38 = vsub.f32 %v1653_v15, %v1404_v17  ;;  %v1408_v39 = vand.u32 4294901760, %v1657_v37 }
 0x148   :  { %v1444_v43 = vsub.f32 %v1655_v0, %v1406_v35 }
 0x149   :  { %v1450_v45 = vsub.f32 %v1657_v37, %v1408_v39  ;;  %v1439_v46 = vand.u32 4294901760, %v1438_v38 }
 0x14a   :  { %v1445_v49 = vand.u32 4294901760, %v1444_v43 }
 0x14b   :  { %v1440_v50 = vsub.f32 %v1438_v38, %v1439_v46  ;;  %v1451_v51 = vand.u32 4294901760, %v1450_v45 }
 0x14c   :  { %v1659_v40 = vpop.eup %1658  ;;  %v1446_v53 = vsub.f32 %v1444_v43, %v1445_v49 }
 0x14d   :  { %v1402_v25 = vand.u32 4294901760, %v1659_v40  ;;  %v1441_v54 = vand.u32 4294901760, %v1440_v50  ;;  %v1452_v55 = vsub.f32 %v1450_v45, %v1451_v51 }
 0x14e   :  { %v1447_v56 = vand.u32 4294901760, %v1446_v53 }
 0x14f   :  { %1403 = vmatpush.msra.mxu0 %v1402_v25  ;;  %1503 = vmatpush.msrb.mxu3 %v1402_v25  ;;  %v1432_v44 = vsub.f32 %v1659_v40, %v1402_v25  ;;  %v1453_v57 = vand.u32 4294901760, %v1452_v55 }
 0x151   :  { %1405 = vmatpush.msra.mxu0 %v1404_v17  ;;  %1474 = vmatpush.msrb.mxu2 %v1432_v44  ;;  %v1433_v48 = vand.u32 4294901760, %v1432_v44 }
 0x152   :  { %1505 = vmatpush.msrb.mxu3 %v1404_v17 }
 0x153   :  { %1407 = vmatpush.msra.mxu0 %v1406_v35  ;;  %1477 = vmatpush.msrb.mxu2 %v1438_v38  ;;  %v1434_v47 = vsub.f32 %v1432_v44, %v1433_v48 }
 0x154   :  { %1507 = vmatpush.msrb.mxu3 %v1406_v35 }
 0x155   :  { %1409 = vmatpush.msra.mxu0 %v1408_v39  ;;  %1480 = vmatpush.msrb.mxu2 %v1444_v43  ;;  %v1435_v52 = vand.u32 4294901760, %v1434_v47 }
 0x156   :  { %1509 = vmatpush.msrb.mxu3 %v1408_v39  ;;  %1415 = vmatmul.f32.vlgmr.msra.gmra.mxu0 %v1976_v41 }
 0x157   :  { %1532 = vmatpush.msrb.mxu0 %v1433_v48  ;;  %1436 = vmatpush.msra.mxu1 %v1435_v52 }
 0x158   :  { %1483 = vmatpush.msrb.mxu2 %v1450_v45  ;;  %1513 = vmatmul.f32.vlgmr.msrb.gmra.mxu3 %v1955_v20 }
 0x159   :  { %1536 = vmatpush.msrb.mxu0 %v1439_v46  ;;  %1486 = vmatmul.f32.vlgmr.msrb.gmra.mxu2 %v1945_v10 }
 0x15a   :  { %1442 = vmatpush.msra.mxu1 %v1441_v54 }
 0x15b   :  { %1540 = vmatpush.msrb.mxu0 %v1445_v49 }
 0x15c   :  { %1448 = vmatpush.msra.mxu1 %v1447_v56 }
 0x15d   :  { %1544 = vmatpush.msrb.mxu0 %v1451_v51 }
 0x15e   :  { %1454 = vmatpush.msra.mxu1 %v1453_v57  ;;  %1546 = vmatmul.f32.vlgmr.msrb.gmra.mxu0 %v1940_v7 }
 0x15f   :  { %1456 = vmatmul.f32.vlgmr.msra.gmra.mxu1 %v1940_v7 }
 0x160   :  { %1563 = vmatpush.msrb.mxu1 %v1402_v25 }
 0x162   :  { %1565 = vmatpush.msrb.mxu1 %v1404_v17 }
 0x164   :  { %1567 = vmatpush.msrb.mxu1 %v1406_v35 }
 0x166   :  { %1569 = vmatpush.msrb.mxu1 %v1408_v39 }
 0x167   :  { %1571 = vmatmul.f32.vlgmr.msrb.gmra.mxu1 %v1940_v7 }
 0x179   :  { %v1046_v10 = vpop.f32.mrf.mxu2 }
 0x181   :  { %v1087_v58 = vpop.f32.mrf.mxu3  ;;  %v1117_v41 = vpop.f32.mrf.mxu2 }
 0x182   :  { %v1088_v59 = vadd.f32 %v1087_v58, %v1046_v10 }
 0x184   :  { %v1118_v60 = vadd.f32 %v1117_v41, %v1088_v59 }
 0x189   :  { %v1144_v20 = vpop.f32.mrf.mxu3  ;;  %v1177_v2 = vpop.f32.mrf.mxu2 }
 0x18a   :  { %v1145_v61 = vadd.f32 %v1144_v20, %v1118_v60 }
 0x18c   :  { %v1178_v3 = vadd.f32 %v1177_v2, %v1145_v61 }
 0x191   :  { %v1202_v4 = vpop.f32.mrf.mxu3 }
 0x192   :  { %v1203_v12 = vadd.f32 %v1202_v4, %v1178_v3 }
 0x194   :  { %v1613_v6 = vclamps-f32 %v1203_v12, 1000000.0 }
 0x196   :  { %1581 = vst [vmem:[#allocation5] sm:$0xff] %v1613_v6 }
 0x199   :  { %v1329_v42 = vpop.f32.mrf.mxu1 }
 0x19a   :  { %v1302_v5 = vpop.f32.mrf.mxu0 }
 0x19d   :  { %v1231_v8 = vpop.f32.mrf.mxu2 }
 0x1a5   :  { %v1362_v7 = vpop.f32.mrf.mxu2 }
 0x1a6   :  { %v1272_v1 = vpop.f32.mrf.mxu3 }
 0x1a7   :  { %v1273_v32 = vadd.f32 %v1272_v1, %v1231_v8 }
 0x1a9   :  { %v1303_v62 = vadd.f32 %v1302_v5, %v1273_v32 }
 0x1ab   :  { %v1330_v63 = vadd.f32 %v1329_v42, %v1303_v62 }
 0x1ad   :  { %v1363_v13 = vadd.f32 %v1362_v7, %v1330_v63 }
 0x1ae   :  { %v1387_v19 = vpop.f32.mrf.mxu3 }
 0x1af   :  { %v1388_v14 = vadd.f32 %v1387_v19, %v1363_v13 }
 0x1b1   :  { %v1614_v16 = vclamps-f32 %v1388_v14, 1000000.0 }
 0x1b3   :  { %1582 = vst [vmem:[#allocation5 + $0x8] sm:$0xff] %v1614_v16 }
 0x1d3   :  { %v1416_v18 = vpop.f32.mrf.mxu0 }
 0x1db   :  { %v1514_v26 = vpop.f32.mrf.mxu3  ;;  %v1547_v27 = vpop.f32.mrf.mxu0 }
 0x1dc   :  { %v1457_v21 = vpop.f32.mrf.mxu1  ;;  %v1487_v22 = vpop.f32.mrf.mxu2 }
 0x1dd   :  { %v1458_v24 = vadd.f32 %v1457_v21, %v1416_v18 }
 0x1df   :  { %v1488_v11 = vadd.f32 %v1487_v22, %v1458_v24 }
 0x1e1   :  { %v1515_v28 = vadd.f32 %v1514_v26, %v1488_v11 }
 0x1e3   :  { %v1548_v30 = vadd.f32 %v1547_v27, %v1515_v28 }
 0x1e4   :  { %v1572_v31 = vpop.f32.mrf.mxu1 }
 0x1e5   :  { %v1573_v33 = vadd.f32 %v1572_v31, %v1548_v30 }
 0x1e7   :  { %v1615_v9 = vclamps-f32 %v1573_v33, 1000000.0 }
 0x1e9   :  { %1583 = vst [vmem:[#allocation5 + $0x10] sm:$0xff] %v1615_v9 }
 0x1ea   :  { %1594 = dma.vmem_to_hbm [thread:$0]  %s1590_s8, 384, %s1592_s11, [#allocation4]  }
 0x1eb   :  { %1710 = dma.done.wait [#allocation4], 384  }
 0x1ec   :  { %1711 = vsyncadd [#allocation4], 4294966912 }
 0x1ed   :  { %1599 = vsyncpa [#allocation3], 1 }
 0x1ee   :  { %1600 = vsyncpa [#allocation4], 1 }

</bundles_post_ra>
